<compile_context>
chip_gen: v5e
topology: v5e:2x2
jax: 0.10.0
libtpu: 0.0.40
codegen_flags: <defaults>
</compile_context>

<pallas_src>
import functools
import math

import jax
import jax.numpy as jnp
from jax.experimental import pallas as pl
from jax.experimental.pallas import tpu as pltpu


def _round_up(x, m):
    return (x + m - 1) // m * m


def _cdiv(a, b):
    return (a + b - 1) // b


def _fcn_block_kernel(x_ref, w_ref, shift_ref, o_ref, *, tap_offsets, ts):
    """Fused conv (KH*KW accumulated K=Cin matmuls) + folded-BN shift + ReLU.

    x_ref:     (1, 1, Cin, Lw)     padded, row-flattened input window
                                   (output tile + halo) for one (batch, tile).
    w_ref:     (KH*KW, Cout, Cin)  BN-scale-folded conv weights, f32.
    shift_ref: (Cout, 1)           folded BN shift (includes conv bias), f32.
    o_ref:     (1, Cout, TS)       lane-dense output tile (TS % 128 == 0).
    """
    xw = x_ref[0, 0]                        # (Cin, Lw) in activation dtype
    acc = None
    for t, d in enumerate(tap_offsets):     # static unroll over KH*KW taps
        # Static (possibly lane-unaligned) slice = tap t's view of the tile.
        xs = xw[:, d:d + ts].astype(jnp.float32)              # (Cin, TS)
        wt = w_ref[t]                                          # (Cout, Cin) f32
        part = jnp.dot(wt, xs, preferred_element_type=jnp.float32)
        acc = part if acc is None else acc + part
    # Folded BatchNorm shift (per output channel, broadcast over lanes) + ReLU.
    y = jnp.maximum(acc + shift_ref[...], 0.0)
    o_ref[0] = y.astype(o_ref.dtype)


def _pick_spatial_tile(s_need, n_batch, cin, cout, halo, x_bytes, out_bytes,
                       *, budget_bytes=12 * (1 << 20), cap=2048, min_steps=4):
    """Largest multiple-of-128 output tile whose double-buffered blocks fit the
    VMEM budget (v5e 16 MiB scoped default is the binding case), shrunk if
    needed so tiny problems still get >= min_steps grid steps (v7x megacore +
    DMA/compute overlap)."""
    ts_cap = max(128, min(cap, _round_up(s_need, 128)))
    ts = 128
    t = 128
    while t <= ts_cap:
        in_blk = _round_up(cin, 8) * _round_up(t + halo, 128) * x_bytes
        out_blk = _round_up(cout, 8) * t * out_bytes
        if 2 * (in_blk + out_blk) <= budget_bytes:
            ts = t
        t += 128
    while ts > 128 and n_batch * _cdiv(s_need, ts) < min_steps:
        ts -= 128
    return ts


def fcn_block2d(x_nchw, w_oihw, conv_bias, bn_gamma, bn_beta, bn_mean, bn_var,
                *, stride=1, padding=1, eps=1e-5,
                compute_dtype=jnp.float32, out_dtype=None):
    """Conv2d(+bias) + eval-mode BatchNorm2d + ReLU fused into one Pallas call.

    compute_dtype: storage/DMA dtype of the activations (HBM-side cast, the
        dominant read of this memory-bound kernel).  Weights stay f32 and the
        matmul accumulates in f32 regardless, so bf16 here only changes the
        activation quantization (addresses the review's precision concern).
    out_dtype: dtype of the output (default: x.dtype).
    """
    n, cin, h, w_dim = x_nchw.shape
    cout, _, kh, kw = w_oihw.shape
    out_dtype = x_nchw.dtype if out_dtype is None else out_dtype
    if conv_bias is None:
        conv_bias = jnp.zeros((cout,), jnp.float32)

    q = h + 2 * padding                      # padded height
    p = w_dim + 2 * padding                  # padded width
    hout = (h + 2 * padding - kh) // stride + 1
    wout = (w_dim + 2 * padding - kw) // stride + 1

    # Flattened padded-space geometry: output pixel (i, j) lives at flat index
    #   s = (i*stride)*P + (j*stride),   and tap (r, c) reads   s + r*P + c.
    # The kernel computes the stride-1 result at every flat position of its
    # tile; the wrapper subsamples / crops afterwards (pure layout plumbing).
    tap_offsets = tuple(r * p + c for r in range(kh) for c in range(kw))
    halo = (kh - 1) * p + (kw - 1)
    s_need = (hout - 1) * stride * p + (wout - 1) * stride + 1

    x_bytes = jnp.dtype(compute_dtype).itemsize
    o_bytes = jnp.dtype(out_dtype).itemsize
    ts = _pick_spatial_tile(s_need, n, cin, cout, halo, x_bytes, o_bytes)
    n_tiles = _cdiv(s_need, ts)
    s_out_pad = n_tiles * ts                 # multiple of 128 -> lane-dense vst
    lw = ts + halo

    # ---- wrapper-side layout plumbing (XLA; ~1x input bytes, no compute) ----
    x = x_nchw.astype(compute_dtype)         # HBM-side cast (halves DMA if bf16)
    x_pad = jnp.pad(x, ((0, 0), (0, 0), (padding, padding), (padding, padding)))
    x_flat = x_pad.reshape(n, cin, q * p)
    lin = max(q * p, s_out_pad + halo)
    if lin > q * p:
        x_flat = jnp.pad(x_flat, ((0, 0), (0, 0), (0, lin - q * p)))
    # Overlapping halo windows, one per output tile: extra HBM ~ halo/ts of the
    # input (vs. 9x with full im2col), and keeps every in-kernel slice static.
    # TODO(synk): for very large images, replace with in-kernel halo DMA
    # (memory_space=pl.ANY + make_async_copy) to drop even this duplication.
    x_win = jnp.stack([x_flat[:, :, i * ts:i * ts + lw] for i in range(n_tiles)],
                      axis=1)                             # (N, n_tiles, Cin, Lw)

    # Fold eval-mode BatchNorm + conv bias: scale goes into the f32 weights
    # (conv is linear), shift stays as a per-channel add in the epilogue.
    inv_std = 1.0 / jnp.sqrt(bn_var.astype(jnp.float32) + eps)
    scale = bn_gamma.astype(jnp.float32) * inv_std                    # (Cout,)
    w_folded = w_oihw.astype(jnp.float32) * scale[:, None, None, None]
    w_taps = jnp.transpose(w_folded, (2, 3, 0, 1)).reshape(kh * kw, cout, cin)
    shift = (bn_beta.astype(jnp.float32)
             + (conv_bias.astype(jnp.float32) - bn_mean.astype(jnp.float32))
             * scale).reshape(cout, 1)

    # Explicit VMEM limit (review: generation-aware; <= 64 MiB fits v7x too).
    need = (2 * (_round_up(cin, 8) * _round_up(lw, 128) * x_bytes
                 + _round_up(cout, 8) * ts * o_bytes)
            + kh * kw * _round_up(cout, 8) * 128 * 4 + 8 * 128 * 4)
    vmem_limit = int(min(64 * (1 << 20), max(32 * (1 << 20), 4 * need)))

    kernel = functools.partial(_fcn_block_kernel, tap_offsets=tap_offsets, ts=ts)
    out = pl.pallas_call(
        kernel,
        out_shape=jax.ShapeDtypeStruct((n, cout, s_out_pad), out_dtype),
        grid_spec=pltpu.PrefetchScalarGridSpec(
            num_scalar_prefetch=0,
            grid=(n, n_tiles),
            in_specs=[
                pl.BlockSpec((1, 1, cin, lw), lambda b, s: (b, s, 0, 0)),
                # Constant-index weight / shift blocks (tiny at this size; add
                # pipeline_mode=pl.Buffered(1) only if Cout*Cin*KH*KW ever gets
                # large enough to pressure v7x's 64 MiB VMEM).
                pl.BlockSpec((kh * kw, cout, cin), lambda b, s: (0, 0, 0)),
                pl.BlockSpec((cout, 1), lambda b, s: (0, 0)),
            ],
            out_specs=pl.BlockSpec((1, cout, ts), lambda b, s: (b, 0, s)),
        ),
        compiler_params=pltpu.CompilerParams(
            dimension_semantics=("parallel", "parallel"),
            vmem_limit_bytes=vmem_limit),
    )(x_win, w_taps, shift)

    # Undo the flat/padded layout: valid flat positions -> (Q, P) grid ->
    # stride subsample -> (Hout, Wout).  Pure XLA layout plumbing.
    y = out[:, :, :s_need]
    if q * p > s_need:
        y = jnp.pad(y, ((0, 0), (0, 0), (0, q * p - s_need)))
    y = y.reshape(n, cout, q, p)
    return y[:, :, ::stride, ::stride][:, :, :hout, :wout]


def fcn_block2d_reference(x_nchw, w_oihw, conv_bias, bn_gamma, bn_beta,
                          bn_mean, bn_var, *, stride=1, padding=1, eps=1e-5):
    """Pure-JAX reference (conv + eval-mode BN + ReLU) for correctness checks."""
    y = jax.lax.conv_general_dilated(
        x_nchw, w_oihw,
        window_strides=(stride, stride),
        padding=[(padding, padding), (padding, padding)],
        dimension_numbers=("NCHW", "OIHW", "NCHW"))
    y = y + conv_bias.reshape(1, -1, 1, 1)
    y = (y - bn_mean.reshape(1, -1, 1, 1)) / jnp.sqrt(
        bn_var.reshape(1, -1, 1, 1) + eps)
    y = y * bn_gamma.reshape(1, -1, 1, 1) + bn_beta.reshape(1, -1, 1, 1)
    return jnp.maximum(y, 0.0)


if __name__ == "__main__":
    # FCN_Block2d(inplane=4, outplane=8, kernel=3, stride=1, padding=1,
    #             bias=True, batchnorm=True), eval mode.
    N, CIN, COUT, H, W = 2, 4, 8, 16, 16
    KH = KW = 3
    STRIDE, PAD = 1, 1

    key = jax.random.PRNGKey(0)
    k_x, k_w, k_b, k_g, k_be, k_m, k_v = jax.random.split(key, 7)

    x = jax.random.normal(k_x, (N, CIN, H, W), jnp.float32)
    fan_in = CIN * KH * KW
    bound = 1.0 / float(math.sqrt(fan_in))
    w = jax.random.uniform(k_w, (COUT, CIN, KH, KW), jnp.float32, -bound, bound)
    conv_bias = jax.random.uniform(k_b, (COUT,), jnp.float32, -bound, bound)
    bn_gamma = 1.0 + 0.1 * jax.random.normal(k_g, (COUT,), jnp.float32)
    bn_beta = 0.1 * jax.random.normal(k_be, (COUT,), jnp.float32)
    bn_mean = 0.1 * jax.random.normal(k_m, (COUT,), jnp.float32)
    bn_var = jax.random.uniform(k_v, (COUT,), jnp.float32, 0.5, 1.5)

    ref = fcn_block2d_reference(x, w, conv_bias, bn_gamma, bn_beta, bn_mean,
                                bn_var, stride=STRIDE, padding=PAD)

    # f32 path (matches PyTorch numerics).
    out = fcn_block2d(x, w, conv_bias, bn_gamma, bn_beta, bn_mean, bn_var,
                      stride=STRIDE, padding=PAD)
    out = jax.block_until_ready(out)
    assert out.shape == (N, COUT, H, W), out.shape
    assert jnp.allclose(out, ref, atol=1e-4, rtol=1e-4), "f32 mismatch vs reference"

    # bf16 activation storage (HBM-side cast) + bf16 output; f32 weights/acc.
    out_bf16 = fcn_block2d(x, w, conv_bias, bn_gamma, bn_beta, bn_mean, bn_var,
                           stride=STRIDE, padding=PAD,
                           compute_dtype=jnp.bfloat16, out_dtype=jnp.bfloat16)
    out_bf16 = jax.block_until_ready(out_bf16)
    assert jnp.allclose(out_bf16.astype(jnp.float32), ref,
                        atol=5e-2, rtol=5e-2), "bf16 path mismatch"

    # Non-square, strided, non-multiple-of-8-channel config to exercise the
    # general geometry path (stride handled by wrapper-side subsampling).
    N2, CIN2, COUT2, H2, W2 = 1, 3, 6, 12, 20
    S2, P2 = 2, 1
    k2 = jax.random.split(jax.random.PRNGKey(1), 7)
    x2 = jax.random.normal(k2[0], (N2, CIN2, H2, W2), jnp.float32)
    b2 = 1.0 / float(math.sqrt(CIN2 * KH * KW))
    w2 = jax.random.uniform(k2[1], (COUT2, CIN2, KH, KW), jnp.float32, -b2, b2)
    bias2 = jax.random.uniform(k2[2], (COUT2,), jnp.float32, -b2, b2)
    g2 = 1.0 + 0.1 * jax.random.normal(k2[3], (COUT2,), jnp.float32)
    be2 = 0.1 * jax.random.normal(k2[4], (COUT2,), jnp.float32)
    m2 = 0.1 * jax.random.normal(k2[5], (COUT2,), jnp.float32)
    v2 = jax.random.uniform(k2[6], (COUT2,), jnp.float32, 0.5, 1.5)

    ref2 = fcn_block2d_reference(x2, w2, bias2, g2, be2, m2, v2,
                                 stride=S2, padding=P2)
    out2 = fcn_block2d(x2, w2, bias2, g2, be2, m2, v2, stride=S2, padding=P2)
    out2 = jax.block_until_ready(out2)
    assert out2.shape == ref2.shape, (out2.shape, ref2.shape)
    assert jnp.allclose(out2, ref2, atol=1e-4, rtol=1e-4), "strided config mismatch"

    print("KERNEL_OK")
</pallas_src>

<mosaic_0001>
module attributes {stable_mosaic.version = 11 : i64} {
  func.func @_fcn_block_kernel(%arg0: i32, %arg1: i32, %arg2: memref<1x1x4x294xf32, #tpu.memory_space<vmem>>, %arg3: memref<9x8x4xf32, #tpu.memory_space<vmem>>, %arg4: memref<8x1xf32, #tpu.memory_space<vmem>>, %arg5: memref<1x8x256xf32, #tpu.memory_space<vmem>>) attributes {dimension_semantics = [#tpu.dimension_semantics<parallel>, #tpu.dimension_semantics<parallel>], iteration_bounds = array<i64: 2, 2>, scalar_prefetch = 0 : i64, scratch_operands = 0 : i64, tpu.core_type = #tpu.core_type<tc>, window_params = [{transform_indices = @transform_0, window_bounds = array<i64: 1, 1, 4, 294>}, {pipeline_mode = #tpu.pipeline_mode<synchronous>, transform_indices = @transform_1, window_bounds = array<i64: 9, 8, 4>}, {pipeline_mode = #tpu.pipeline_mode<synchronous>, transform_indices = @transform_2, window_bounds = array<i64: 8, 1>}, {transform_indices = @transform_3, window_bounds = array<i64: 1, 8, 256>}]} {
    %c0 = arith.constant 0 : index
    %c0_0 = arith.constant 0 : index
    %c0_1 = arith.constant 0 : index
    %c0_2 = arith.constant 0 : index
    %0 = vector.load %arg2[%c0, %c0_0, %c0_1, %c0_2] : memref<1x1x4x294xf32, #tpu.memory_space<vmem>>, vector<1x1x4x294xf32>
    %1 = vector.shape_cast %0 : vector<1x1x4x294xf32> to vector<4x294xf32>
    %2 = vector.extract_strided_slice %1 {offsets = [0, 0], sizes = [4, 256], strides = [1, 1]} : vector<4x294xf32> to vector<4x256xf32>
    %c0_3 = arith.constant 0 : index
    %c0_4 = arith.constant 0 : index
    %c0_5 = arith.constant 0 : index
    %3 = vector.load %arg3[%c0_3, %c0_4, %c0_5] : memref<9x8x4xf32, #tpu.memory_space<vmem>>, vector<1x8x4xf32>
    %4 = vector.shape_cast %3 : vector<1x8x4xf32> to vector<8x4xf32>
    %cst = arith.constant dense<0.000000e+00> : vector<8x256xf32>
    %5 = tpu.matmul %4, %2, %cst {dimension_numbers = #tpu.dot_dimension_numbers<[1], [0], [0], [1], [0, 0, 1, 1], [], []>} : vector<8x4xf32>, vector<4x256xf32>, vector<8x256xf32> -> vector<8x256xf32>
    %6 = vector.extract_strided_slice %1 {offsets = [0, 1], sizes = [4, 256], strides = [1, 1]} : vector<4x294xf32> to vector<4x256xf32>
    %c1 = arith.constant 1 : index
    %c0_6 = arith.constant 0 : index
    %c0_7 = arith.constant 0 : index
    %7 = vector.load %arg3[%c1, %c0_6, %c0_7] : memref<9x8x4xf32, #tpu.memory_space<vmem>>, vector<1x8x4xf32>
    %8 = vector.shape_cast %7 : vector<1x8x4xf32> to vector<8x4xf32>
    %cst_8 = arith.constant dense<0.000000e+00> : vector<8x256xf32>
    %9 = tpu.matmul %8, %6, %cst_8 {dimension_numbers = #tpu.dot_dimension_numbers<[1], [0], [0], [1], [0, 0, 1, 1], [], []>} : vector<8x4xf32>, vector<4x256xf32>, vector<8x256xf32> -> vector<8x256xf32>
    %10 = arith.addf %5, %9 : vector<8x256xf32>
    %11 = vector.extract_strided_slice %1 {offsets = [0, 2], sizes = [4, 256], strides = [1, 1]} : vector<4x294xf32> to vector<4x256xf32>
    %c2 = arith.constant 2 : index
    %c0_9 = arith.constant 0 : index
    %c0_10 = arith.constant 0 : index
    %12 = vector.load %arg3[%c2, %c0_9, %c0_10] : memref<9x8x4xf32, #tpu.memory_space<vmem>>, vector<1x8x4xf32>
    %13 = vector.shape_cast %12 : vector<1x8x4xf32> to vector<8x4xf32>
    %cst_11 = arith.constant dense<0.000000e+00> : vector<8x256xf32>
    %14 = tpu.matmul %13, %11, %cst_11 {dimension_numbers = #tpu.dot_dimension_numbers<[1], [0], [0], [1], [0, 0, 1, 1], [], []>} : vector<8x4xf32>, vector<4x256xf32>, vector<8x256xf32> -> vector<8x256xf32>
    %15 = arith.addf %10, %14 : vector<8x256xf32>
    %16 = vector.extract_strided_slice %1 {offsets = [0, 18], sizes = [4, 256], strides = [1, 1]} : vector<4x294xf32> to vector<4x256xf32>
    %c3 = arith.constant 3 : index
    %c0_12 = arith.constant 0 : index
    %c0_13 = arith.constant 0 : index
    %17 = vector.load %arg3[%c3, %c0_12, %c0_13] : memref<9x8x4xf32, #tpu.memory_space<vmem>>, vector<1x8x4xf32>
    %18 = vector.shape_cast %17 : vector<1x8x4xf32> to vector<8x4xf32>
    %cst_14 = arith.constant dense<0.000000e+00> : vector<8x256xf32>
    %19 = tpu.matmul %18, %16, %cst_14 {dimension_numbers = #tpu.dot_dimension_numbers<[1], [0], [0], [1], [0, 0, 1, 1], [], []>} : vector<8x4xf32>, vector<4x256xf32>, vector<8x256xf32> -> vector<8x256xf32>
    %20 = arith.addf %15, %19 : vector<8x256xf32>
    %21 = vector.extract_strided_slice %1 {offsets = [0, 19], sizes = [4, 256], strides = [1, 1]} : vector<4x294xf32> to vector<4x256xf32>
    %c4 = arith.constant 4 : index
    %c0_15 = arith.constant 0 : index
    %c0_16 = arith.constant 0 : index
    %22 = vector.load %arg3[%c4, %c0_15, %c0_16] : memref<9x8x4xf32, #tpu.memory_space<vmem>>, vector<1x8x4xf32>
    %23 = vector.shape_cast %22 : vector<1x8x4xf32> to vector<8x4xf32>
    %cst_17 = arith.constant dense<0.000000e+00> : vector<8x256xf32>
    %24 = tpu.matmul %23, %21, %cst_17 {dimension_numbers = #tpu.dot_dimension_numbers<[1], [0], [0], [1], [0, 0, 1, 1], [], []>} : vector<8x4xf32>, vector<4x256xf32>, vector<8x256xf32> -> vector<8x256xf32>
    %25 = arith.addf %20, %24 : vector<8x256xf32>
    %26 = vector.extract_strided_slice %1 {offsets = [0, 20], sizes = [4, 256], strides = [1, 1]} : vector<4x294xf32> to vector<4x256xf32>
    %c5 = arith.constant 5 : index
    %c0_18 = arith.constant 0 : index
    %c0_19 = arith.constant 0 : index
    %27 = vector.load %arg3[%c5, %c0_18, %c0_19] : memref<9x8x4xf32, #tpu.memory_space<vmem>>, vector<1x8x4xf32>
    %28 = vector.shape_cast %27 : vector<1x8x4xf32> to vector<8x4xf32>
    %cst_20 = arith.constant dense<0.000000e+00> : vector<8x256xf32>
    %29 = tpu.matmul %28, %26, %cst_20 {dimension_numbers = #tpu.dot_dimension_numbers<[1], [0], [0], [1], [0, 0, 1, 1], [], []>} : vector<8x4xf32>, vector<4x256xf32>, vector<8x256xf32> -> vector<8x256xf32>
    %30 = arith.addf %25, %29 : vector<8x256xf32>
    %31 = vector.extract_strided_slice %1 {offsets = [0, 36], sizes = [4, 256], strides = [1, 1]} : vector<4x294xf32> to vector<4x256xf32>
    %c6 = arith.constant 6 : index
    %c0_21 = arith.constant 0 : index
    %c0_22 = arith.constant 0 : index
    %32 = vector.load %arg3[%c6, %c0_21, %c0_22] : memref<9x8x4xf32, #tpu.memory_space<vmem>>, vector<1x8x4xf32>
    %33 = vector.shape_cast %32 : vector<1x8x4xf32> to vector<8x4xf32>
    %cst_23 = arith.constant dense<0.000000e+00> : vector<8x256xf32>
    %34 = tpu.matmul %33, %31, %cst_23 {dimension_numbers = #tpu.dot_dimension_numbers<[1], [0], [0], [1], [0, 0, 1, 1], [], []>} : vector<8x4xf32>, vector<4x256xf32>, vector<8x256xf32> -> vector<8x256xf32>
    %35 = arith.addf %30, %34 : vector<8x256xf32>
    %36 = vector.extract_strided_slice %1 {offsets = [0, 37], sizes = [4, 256], strides = [1, 1]} : vector<4x294xf32> to vector<4x256xf32>
    %c7 = arith.constant 7 : index
    %c0_24 = arith.constant 0 : index
    %c0_25 = arith.constant 0 : index
    %37 = vector.load %arg3[%c7, %c0_24, %c0_25] : memref<9x8x4xf32, #tpu.memory_space<vmem>>, vector<1x8x4xf32>
    %38 = vector.shape_cast %37 : vector<1x8x4xf32> to vector<8x4xf32>
    %cst_26 = arith.constant dense<0.000000e+00> : vector<8x256xf32>
    %39 = tpu.matmul %38, %36, %cst_26 {dimension_numbers = #tpu.dot_dimension_numbers<[1], [0], [0], [1], [0, 0, 1, 1], [], []>} : vector<8x4xf32>, vector<4x256xf32>, vector<8x256xf32> -> vector<8x256xf32>
    %40 = arith.addf %35, %39 : vector<8x256xf32>
    %41 = vector.extract_strided_slice %1 {offsets = [0, 38], sizes = [4, 256], strides = [1, 1]} : vector<4x294xf32> to vector<4x256xf32>
    %c8 = arith.constant 8 : index
    %c0_27 = arith.constant 0 : index
    %c0_28 = arith.constant 0 : index
    %42 = vector.load %arg3[%c8, %c0_27, %c0_28] : memref<9x8x4xf32, #tpu.memory_space<vmem>>, vector<1x8x4xf32>
    %43 = vector.shape_cast %42 : vector<1x8x4xf32> to vector<8x4xf32>
    %cst_29 = arith.constant dense<0.000000e+00> : vector<8x256xf32>
    %44 = tpu.matmul %43, %41, %cst_29 {dimension_numbers = #tpu.dot_dimension_numbers<[1], [0], [0], [1], [0, 0, 1, 1], [], []>} : vector<8x4xf32>, vector<4x256xf32>, vector<8x256xf32> -> vector<8x256xf32>
    %45 = arith.addf %40, %44 : vector<8x256xf32>
    %c0_30 = arith.constant 0 : index
    %c0_31 = arith.constant 0 : index
    %46 = vector.load %arg4[%c0_30, %c0_31] : memref<8x1xf32, #tpu.memory_space<vmem>>, vector<8x1xf32>
    %47 = vector.broadcast %46 : vector<8x1xf32> to vector<8x256xf32>
    %48 = arith.addf %45, %47 : vector<8x256xf32>
    %cst_32 = arith.constant 0.000000e+00 : f32
    %49 = vector.broadcast %cst_32 : f32 to vector<8x256xf32>
    %50 = arith.maximumf %48, %49 : vector<8x256xf32>
    %c0_33 = arith.constant 0 : index
    %c0_34 = arith.constant 0 : index
    %c0_35 = arith.constant 0 : index
    %51 = vector.load %arg5[%c0_33, %c0_34, %c0_35] : memref<1x8x256xf32, #tpu.memory_space<vmem>>, vector<1x8x256xf32>
    %52 = vector.shape_cast %51 : vector<1x8x256xf32> to vector<8x256xf32>
    %53 = vector.shape_cast %50 : vector<8x256xf32> to vector<1x8x256xf32>
    tpu.vector_store %arg5[%c0_33, %c0_34, %c0_35], %53 {strides = array<i32>} : memref<1x8x256xf32, #tpu.memory_space<vmem>>, vector<1x8x256xf32>,
    return
  }
  func.func @transform_0(%arg0: i32, %arg1: i32) -> (i32, i32, i32, i32) {
    %c0_i32 = arith.constant 0 : i32
    %c0_i32_0 = arith.constant 0 : i32
    %c0_i32_1 = arith.constant 0 : i32
    return %arg0, %arg1, %c0_i32, %c0_i32_0 : i32, i32, i32, i32
  }
  func.func @transform_1(%arg0: i32, %arg1: i32) -> (i32, i32, i32) {
    %c0_i32 = arith.constant 0 : i32
    %c0_i32_0 = arith.constant 0 : i32
    %c0_i32_1 = arith.constant 0 : i32
    %c0_i32_2 = arith.constant 0 : i32
    return %c0_i32, %c0_i32_0, %c0_i32_1 : i32, i32, i32
  }
  func.func @transform_2(%arg0: i32, %arg1: i32) -> (i32, i32) {
    %c0_i32 = arith.constant 0 : i32
    %c0_i32_0 = arith.constant 0 : i32
    %c0_i32_1 = arith.constant 0 : i32
    return %c0_i32, %c0_i32_0 : i32, i32
  }
  func.func @transform_3(%arg0: i32, %arg1: i32) -> (i32, i32, i32) {
    %c0_i32 = arith.constant 0 : i32
    %c0_i32_0 = arith.constant 0 : i32
    return %arg0, %c0_i32, %arg1 : i32, i32, i32
  }
}

</mosaic_0001>

<bundles_post_ra>
// kernel: tpu_custom_call.1
= control target key start
LH: loop header
LB: loop body
LE: loop exit
PB: predicated region body
PF: predicated region fallthrough
CT: control target
= control target key end

     0   :  { %8 = vsyncpa [#allocation3], 0  ;;  %s1366_s0 = inlined_call_operand.vmem [shape: f32[2,2,4,294], index: 0, kind: input, shape index: {}]   ;;  %s1367_s1 = inlined_call_operand.vmem [shape: f32[9,8,4], index: 1, kind: input, shape index: {}]   ;;  %s1368_s2 = inlined_call_operand.vmem [shape: f32[8,1], index: 2, kind: input, shape index: {}]   ;;  %s1369_s3 = inlined_call_operand.hbm [shape: f32[2,8,512], index: 3, kind: output, shape index: {}]  }
   0x1   :  { %10 = vsyncpa [#allocation3 + $0x1], 0  ;;  %s1159_s12 = smov 0   ;;  %s1161_s13 = smov 0  }
   0x2   :  { %s1163_s14 = smov 0   ;;  %s1165_s15 = smov 0  }
   0x3   :  { %s1167_s16 = smov 0   ;;  %s1169_s17 = smov 0  }
   0x4   :  { %s1171_s18 = smov 0   ;;  %s1173_s19 = smov 0  }
   0x5 LB: > { %s894_s20 = sadd.s32 4294967295, %s1128_s19   ;;  %s895_s21 = sadd.s32 4294967294, %s1128_s19   ;;  %s1128_s19 = sphi %s1173_s19, %s16_s19   ;;  %s1124_s18 = sphi %s1171_s18, %s1378_s18   ;;  %s1120_s17 = sphi %s1169_s17, %s1377_s17   ;;  %s1116_s16 = sphi %s1167_s16, %s1376_s16   ;;  %s1112_s15 = sphi %s1165_s15, %s1375_s15   ;;  %s1108_s14 = sphi %s1163_s14, %s1374_s14   ;;  %s1104_s13 = sphi %s1161_s13, %s1373_s13   ;;  %s1100_s12 = sphi %s1159_s12, %s1372_s12  }
   0x6   : > { %s25_s22 = sadd.s32 1, %s1120_s17  ;;  %s28_s23 = sadd.s32 1, %s1124_s18 }
   0x7   : > { %p26_p0 = scmp.ge.s32.totalorder %s25_s22, 2  ;;  %p117_p1 = scmp.ne.s32.totalorder %s1108_s14, %s1104_s13 }
   0x8   : > { %p118_p2 = scmp.eq.s32.totalorder %s894_s20, 3  ;;  %p123_p5 = scmp.ne.s32.totalorder %s1104_s13, %s1100_s12 }
   0x9   : > { %s1380_s22 = smov (%p26_p0, %s25_s22), 0  ;;  %s1382_s23 = smov (!%p26_p0, %s28_s23), %s1124_s18 }
   0xa   : > { %s103_s24 = ssub.s32 %s1120_s17, %s1380_s22  ;;  %p1210_p3 = por %p118_p2, %p117_p1 }
   0xb   : > { %p30_p4 = scmp.ge.s32.totalorder %s1382_s23, 2  ;;  %p124_p6 = scmp.eq.s32.totalorder %s895_s21, 3 }
   0xc   : > { %p898_p7 = scmp.ge.s32.totalorder %s1128_s19, 1  ;;  %p160_p9 = scmp.lt.s32.totalorder %s1128_s19, 5 }
   0xd   : > { %s1384_s23 = smov (%p30_p4, %s1382_s23), 0  ;;  %p1219_p8 = por %p124_p6, %p123_p5 }
   0xe   : > { %s102_s27 = ssub.s32 %s1124_s18, %s1384_s23  ;;  %s107_s28 = sadd.s32 1, %s1108_s14 }
   0xf   : > { %s104_s29 = sor.u32 %s103_s24, %s102_s27  ;;  %p161_p10 = pnand %p898_p7, %p160_p9 }
  0x10   : > { %p105_p11 = scmp.eq.s32.totalorder %s104_s29, 0  ;;  %p188_p12 = scmp.lt.s32.totalorder (!%p161_p10), %s1116_s16, 1 }
  0x11   : > { %164 = sbr.rel (%p161_p10) target bundleno = 356 (0x164), region = 32  ;;  %p190_p13 = scmp.lt.s32.totalorder (!%p161_p10), %s1112_s15, 1 }
  0x12   : > { %s1228_s30 = scalar_select %p105_p11, %s1108_s14, %s107_s28  }
  0x13   : > { %s1130_s21 = smov (!%p161_p10), 127   ;;  %s1131_s24 = smov (!%p161_p10), 126  }
  0x14   : > { %s1132_s27 = smov (!%p161_p10), 110   ;;  %s1133_s28 = smov (!%p161_p10), 109  }
  0x15   : > { %s1134_s29 = smov (!%p161_p10), 108  }
  0x16   : > { %s189_s4 = scalar_select %p188_p12, %s1116_s16, 1  ;;  %vm224_vm0 = vcmask 1043456   ;;  %vm220_vm1 = vcmask 31744   ;;  %v200_v28 = vld [vmem:[%s1367_s1] sm:$0xff]  ;;  %vm333_vm2 = vcmask 1031168   ;;  %vm217_vm3 = vcmask 1039360  }
  0x17   : > { %s191_s5 = scalar_select %p190_p13, %s1112_s15, 1  ;;  %v901_v35 = vld [vmem:[%s1367_s1 + $0x8] sm:$0xff]  ;;  %v910_v40 = vld [vmem:[%s1367_s1 + $0x10] sm:$0xff]  ;;  %vm399_vm4 = vcmask 900096   ;;  %v915_v45 = vld [vmem:[%s1367_s1 + $0x18] sm:$0xff]  ;;  %vm465_vm5 = vcmask 891904  }
  0x18   : > { %s952_s6 = smul.u32 6, %s189_s4  ;;  %s1135_s4 = smov 92   ;;  %v920_v51 = vld [vmem:[%s1367_s1 + $0x20] sm:$0xff]  ;;  %v1138_v55 = vmov 0   ;;  %vm531_vm6 = vcmask 883712   ;;  %v925_v58 = vld [vmem:[%s1367_s1 + $0x28] sm:$0xff] }
  0x19   : > { %s951_s7 = smul.u32 3, %s191_s5  ;;  %s1136_s5 = smov 91   ;;  %v781_v54 = vld [vmem:[%s1368_s2] sm:$0xff]  ;;  %1033 = vset.pattern.permute.xlu0 %v1138_v55  ;;  %vm597_vm7 = vcmask 752640   ;;  %vm663_vm8 = vcmask 744448   ;;  %vm729_vm9 = vcmask 736256  }
  0x1b   : > { %s194_s8 = sadd.s32 %s952_s6, %s951_s7  ;;  %s1137_s6 = smov 90  }
  0x1c   : > { %s900_s9 = sshll.u32 %s194_s8, 2 }
  0x1d   : > { %s196_s20 = scalar_lea.vmem %s1366_s0, %s900_s9 }
  0x1e   : > { %v1237_v0 = vld [vmem:[%s196_s20] sm:$0xff]  ;;  %v199_v1 = vld [vmem:[%s196_s20 + $0x8] sm:$0xf] }
  0x1f   : > { %205 = vst [vmem:[#allocation1] ss:$2 sm:$0xff] %v1237_v0 }
  0x20   : > { %207 = vst [vmem:[#allocation1 + $0x10] ss:$2 sm:$0xff] %v199_v1 }
  0x26   : > { %v208_v2 = vld.sshfl [vmem:[#allocation1] sm:$0xff pattern:$0x75316420]  ;;  %v209_v3 = vld.sshfl [vmem:[#allocation1 + $0x8] sm:$0xff pattern:$0x75316420] }
  0x27   : > { %211 = vrot.lane.b32.xlu0 %v208_v2, %s1130_s21  ;;  %v210_v4 = vld.sshfl [vmem:[#allocation1 + $0x10] sm:$0xff pattern:$0x75316420]  ;;  %269 = vst [vmem:[#allocation1] ss:$2 sm:$0xff] %v1237_v0 }
  0x28   : > { %215 = vrot.lane.b32.xlu1 %v210_v4, %s1130_s21  ;;  %323 = vst [vmem:[#allocation1 + $0x10] ss:$2 sm:$0xff] %v199_v1 }
  0x2e   : > { %v1241_v5 = vld.sshfl [vmem:[#allocation1] sm:$0xff pattern:$0x75316420]  ;;  %v1243_v6 = vld.sshfl [vmem:[#allocation1 + $0x8] sm:$0xff pattern:$0x75316420] }
  0x2f   : > { %213 = vrot.lane.b32.xlu0 %v209_v3, %s1130_s21  ;;  %321 = vst [vmem:[#allocation1] ss:$2 sm:$0xff] %v1237_v0  ;;  %v326_v7 = vld.sshfl [vmem:[#allocation1 + $0x10] sm:$0xff pattern:$0x75316420]  ;;  %906 = vmatpush.msk.msra.mxu2 %vm224_vm0, %v1241_v5  ;;  %s946_s21 = sshll.u32 %s1112_s15, 1 }
  0x30   : > { %331 = vrot.lane.b32.xlu2 %v326_v7, %s1131_s24  ;;  %389 = vst [vmem:[#allocation1 + $0x10] ss:$2 sm:$0xff] %v199_v1  ;;  %908 = vmatpush.msk.msra.mxu3 %vm224_vm0, %v1243_v6  ;;  %v935_v6 = vld [vmem:[%s1367_s1 + $0x38] sm:$0xff] }
  0x31   : > { %907 = vmatmul.msk.f32.vlgmr.msra.gmra.mxu2 %vm220_vm1, %v200_v28  ;;  %909 = vmatmul.msk.f32.vlgmr.msra.gmra.mxu3 %vm220_vm1, %v200_v28 }
  0x36   : > { %v324_v8 = vld.sshfl [vmem:[#allocation1] sm:$0xff pattern:$0x75316420]  ;;  %v325_v9 = vld.sshfl [vmem:[#allocation1 + $0x8] sm:$0xff pattern:$0x75316420] }
  0x37   : > { %327 = vrot.lane.b32.xlu1 %v324_v8, %s1131_s24  ;;  %387 = vst [vmem:[#allocation1] ss:$2 sm:$0xff] %v1237_v0  ;;  %v392_v10 = vld.sshfl [vmem:[#allocation1 + $0x10] sm:$0xff pattern:$0x75316420] }
  0x38   : > { %329 = vrot.lane.b32.xlu2 %v325_v9, %s1131_s24  ;;  %455 = vst [vmem:[#allocation1 + $0x10] ss:$2 sm:$0xff] %v199_v1  ;;  %s947_s24 = sshll.u32 %s1116_s16, 2 }
  0x3e   : > { %v391_v11 = vld.sshfl [vmem:[#allocation1 + $0x8] sm:$0xff pattern:$0x75316420]  ;;  %v390_v12 = vld.sshfl [vmem:[#allocation1] sm:$0xff pattern:$0x75316420] }
  0x3f   : > { %395 = vrot.lane.b32.xlu1 %v391_v11, %s1132_s27  ;;  %393 = vrot.lane.b32.xlu0 %v390_v12, %s1132_s27  ;;  %453 = vst [vmem:[#allocation1] ss:$2 sm:$0xff] %v1237_v0  ;;  %v458_v13 = vld.sshfl [vmem:[#allocation1 + $0x10] sm:$0xff pattern:$0x75316420]  ;;  %v940_v12 = vld [vmem:[%s1367_s1 + $0x40] sm:$0xff] }
  0x40   : > { %397 = vrot.lane.b32.xlu2 %v392_v10, %s1132_s27  ;;  %521 = vst [vmem:[#allocation1 + $0x10] ss:$2 sm:$0xff] %v199_v1  ;;  %s185_s27 = sand.u32 1, %s1104_s13  }
  0x41   : > { %s794_s9 = scalar_lea.sflag [#allocation3], %s185_s27 }
  0x46   : > { %v457_v14 = vld.sshfl [vmem:[#allocation1 + $0x8] sm:$0xff pattern:$0x75316420]  ;;  %v456_v15 = vld.sshfl [vmem:[#allocation1] sm:$0xff pattern:$0x75316420] }
  0x47   : > { %461 = vrot.lane.b32.xlu1 %v457_v14, %s1133_s28  ;;  %459 = vrot.lane.b32.xlu0 %v456_v15, %s1133_s28  ;;  %519 = vst [vmem:[#allocation1] ss:$2 sm:$0xff] %v1237_v0  ;;  %v524_v16 = vld.sshfl [vmem:[#allocation1 + $0x10] sm:$0xff pattern:$0x75316420] }
  0x48   : > { %463 = vrot.lane.b32.xlu2 %v458_v13, %s1133_s28  ;;  %587 = vst [vmem:[#allocation1 + $0x10] ss:$2 sm:$0xff] %v199_v1  ;;  %s805_s28 = sadd.s32 %s947_s24, %s946_s21  ;;  %s1054_s24 = scalar_lea.hbm %s1369_s3, 64 }
  0x4e   : > { %v523_v17 = vld.sshfl [vmem:[#allocation1 + $0x8] sm:$0xff pattern:$0x75316420]  ;;  %v522_v18 = vld.sshfl [vmem:[#allocation1] sm:$0xff pattern:$0x75316420] }
  0x4f   : > { %527 = vrot.lane.b32.xlu1 %v523_v17, %s1134_s29  ;;  %525 = vrot.lane.b32.xlu0 %v522_v18, %s1134_s29  ;;  %585 = vst [vmem:[#allocation1] ss:$2 sm:$0xff] %v1237_v0  ;;  %v590_v19 = vld.sshfl [vmem:[#allocation1 + $0x10] sm:$0xff pattern:$0x75316420] }
  0x50   : > { %529 = vrot.lane.b32.xlu2 %v524_v16, %s1134_s29  ;;  %653 = vst [vmem:[#allocation1 + $0x10] ss:$2 sm:$0xff] %v199_v1  ;;  %s899_s29 = sshll.u32 %s185_s27, 4 }
  0x56   : > { %v589_v20 = vld.sshfl [vmem:[#allocation1 + $0x8] sm:$0xff pattern:$0x75316420]  ;;  %v588_v21 = vld.sshfl [vmem:[#allocation1] sm:$0xff pattern:$0x75316420] }
  0x57   : > { %593 = vrot.lane.b32.xlu1 %v589_v20, %s1135_s4  ;;  %591 = vrot.lane.b32.xlu0 %v588_v21, %s1135_s4  ;;  %651 = vst [vmem:[#allocation1] ss:$2 sm:$0xff] %v1237_v0  ;;  %v656_v22 = vld.sshfl [vmem:[#allocation1 + $0x10] sm:$0xff pattern:$0x75316420] }
  0x58   : > { %595 = vrot.lane.b32.xlu2 %v590_v19, %s1135_s4  ;;  %719 = vst [vmem:[#allocation1 + $0x10] ss:$2 sm:$0xff] %v199_v1  ;;  %s948_s4 = sshll.u32 %s805_s28, 3 }
  0x59   : > { %s807_s16 = scalar_lea.hbm %s1369_s3, %s948_s4 }
  0x5a   : > { %s811_s8 = sshll.u32 %s807_s16, 4  ;;  %s812_s8 = int_to_ptr.hbm [resolvable:$true] %s811_s8 }
  0x5b   : > { %s1048_s10 = sshra.s32 %s812_s8, 4  ;;  %s1049_s10 = int_to_ptr.hbm [resolvable:$true] %s1048_s10 }
  0x5c   : > { %s1050_s11 = scalar_lea.hbm %s1049_s10, 16  ;;  %p1055_p4 = scmp.lt.s32.totalorder %s1049_s10, %s1369_s3 }
  0x5d   : > { %p1051_p0 = scmp.ne.s32.totalorder %s1049_s10, %s1050_s11  ;;  %p1056_p5 = scmp.lt.s32.totalorder %s1054_s24, %s1050_s11 }
  0x5e   : > { %v655_v23 = vld.sshfl [vmem:[#allocation1 + $0x8] sm:$0xff pattern:$0x75316420]  ;;  %v654_v24 = vld.sshfl [vmem:[#allocation1] sm:$0xff pattern:$0x75316420] }
  0x5f   : > { %659 = vrot.lane.b32.xlu1 %v655_v23, %s1136_s5  ;;  %657 = vrot.lane.b32.xlu0 %v654_v24, %s1136_s5  ;;  %717 = vst [vmem:[#allocation1] ss:$2 sm:$0xff] %v1237_v0  ;;  %v722_v25 = vld.sshfl [vmem:[#allocation1 + $0x10] sm:$0xff pattern:$0x75316420]  ;;  %p1052_p1 = pnand %p1051_p0, %p1210_p3  ;;  %p1057_p6 = por %p1056_p5, %p1055_p4 }
  0x60   : > { %661 = vrot.lane.b32.xlu2 %v656_v22, %s1136_s5  ;;  %v930_v0 = vld [vmem:[%s1367_s1 + $0x30] sm:$0xff] }
  0x61   : > { %p1053_p2 = pneg %p1052_p1 }
  0x63   : > { %p1058_p7 = pnand %p1057_p6, %p1053_p2 }
  0x66   : > { %v721_v26 = vld.sshfl [vmem:[#allocation1 + $0x8] sm:$0xff pattern:$0x75316420]  ;;  %v720_v27 = vld.sshfl [vmem:[#allocation1] sm:$0xff pattern:$0x75316420] }
  0x67   : > { %725 = vrot.lane.b32.xlu1 %v721_v26, %s1137_s6  ;;  %723 = vrot.lane.b32.xlu0 %v720_v27, %s1137_s6 }
  0x68   : > { %727 = vrot.lane.b32.xlu2 %v722_v25, %s1137_s6  ;;  %s187_s6 = scalar_lea.vmem [#allocation2], %s899_s29 }
  0x69   : > { %s809_s7 = sshll.u32 %s187_s6, 4  ;;  %s810_s7 = int_to_ptr.vmem [resolvable:$true] %s809_s7 }
  0x6f   : > { %784 = vperm.xlu0 %1033, %v781_v54  }
  0x8a   : > { %v332_v29 = vpop.permute.xlu2 %331 }
  0x92   : > { %v330_v31 = vpop.permute.xlu2 %329 }
  0x93   : > { %v335_v34 = vsel %vm333_vm2, %v330_v31, %v332_v29 }
  0x99   : > { %v212_v30 = vpop.permute.xlu0 %211 }
  0x9a   : > { %v216_v32 = vpop.permute.xlu1 %215  ;;  %v398_v38 = vpop.permute.xlu2 %397 }
  0xa1   : > { %v214_v33 = vpop.permute.xlu0 %213 }
  0xa2   : > { %v218_v36 = vsel %vm217_vm3, %v212_v30, %v214_v33  ;;  %v219_v37 = vsel %vm217_vm3, %v214_v33, %v216_v32  ;;  %v464_v42 = vpop.permute.xlu2 %463 }
  0xa3   : > { %902 = vmatpush.msk.msra.mxu0 %vm224_vm0, %v218_v36  ;;  %904 = vmatpush.msk.msra.mxu1 %vm224_vm0, %v219_v37 }
  0xa4   : > { %903 = vmatmul.msk.f32.vlgmr.msra.gmra.mxu0 %vm220_vm1, %v901_v35  ;;  %905 = vmatmul.msk.f32.vlgmr.msra.gmra.mxu1 %vm220_vm1, %v901_v35 }
  0xa5   : > { %913 = vmatpush.msk.msrb.mxu1 %vm224_vm0, %v335_v34 }
  0xa9   : > { %v328_v39 = vpop.permute.xlu1 %327 }
  0xaa   : > { %v334_v41 = vsel %vm333_vm2, %v328_v39, %v330_v31  ;;  %v530_v48 = vpop.permute.xlu2 %529 }
  0xab   : > { %911 = vmatpush.msk.msrb.mxu0 %vm224_vm0, %v334_v41 }
  0xac   : > { %912 = vmatmul.msk.f32.vlgmr.msrb.gmra.mxu0 %vm220_vm1, %v910_v40  ;;  %914 = vmatmul.msk.f32.vlgmr.msrb.gmra.mxu1 %vm220_vm1, %v910_v40 }
  0xb1   : > { %v396_v43 = vpop.permute.xlu1 %395  ;;  %v394_v44 = vpop.permute.xlu0 %393 }
  0xb2   : > { %v400_v46 = vsel %vm399_vm4, %v394_v44, %v396_v43  ;;  %v401_v47 = vsel %vm399_vm4, %v396_v43, %v398_v38  ;;  %v596_v61 = vpop.permute.xlu2 %595 }
  0xb3   : > { %916 = vmatpush.msk.msrb.mxu2 %vm224_vm0, %v400_v46  ;;  %918 = vmatpush.msk.msrb.mxu3 %vm224_vm0, %v401_v47 }
  0xb4   : > { %917 = vmatmul.msk.f32.vlgmr.msrb.gmra.mxu2 %vm220_vm1, %v915_v45  ;;  %919 = vmatmul.msk.f32.vlgmr.msrb.gmra.mxu3 %vm220_vm1, %v915_v45  ;;  %v296_v17 = vpop.f32.mrf.mxu2  ;;  %v316_v18 = vpop.f32.mrf.mxu3 }
  0xb9   : > { %v462_v49 = vpop.permute.xlu1 %461  ;;  %v460_v50 = vpop.permute.xlu0 %459 }
  0xba   : > { %v467_v52 = vsel %vm465_vm5, %v462_v49, %v464_v42  ;;  %v466_v53 = vsel %vm465_vm5, %v460_v50, %v462_v49  ;;  %v662_v3 = vpop.permute.xlu2 %661 }
  0xbb   : > { %921 = vmatpush.msk.msra.mxu0 %vm224_vm0, %v466_v53  ;;  %923 = vmatpush.msk.msra.mxu1 %vm224_vm0, %v467_v52 }
  0xbc   : > { %922 = vmatmul.msk.f32.vlgmr.msra.gmra.mxu0 %vm220_vm1, %v920_v51  ;;  %924 = vmatmul.msk.f32.vlgmr.msra.gmra.mxu1 %vm220_vm1, %v920_v51 }
  0xc1   : > { %v528_v56 = vpop.permute.xlu1 %527  ;;  %v526_v57 = vpop.permute.xlu0 %525 }
  0xc2   : > { %v533_v59 = vsel %vm531_vm6, %v528_v56, %v530_v48  ;;  %v532_v60 = vsel %vm531_vm6, %v526_v57, %v528_v56  ;;  %v728_v9 = vpop.permute.xlu2 %727 }
  0xc3   : > { %926 = vmatpush.msk.msra.mxu2 %vm224_vm0, %v532_v60  ;;  %928 = vmatpush.msk.msra.mxu3 %vm224_vm0, %v533_v59 }
  0xc4   : > { %927 = vmatmul.msk.f32.vlgmr.msra.gmra.mxu2 %vm220_vm1, %v925_v58  ;;  %929 = vmatmul.msk.f32.vlgmr.msra.gmra.mxu3 %vm220_vm1, %v925_v58 }
  0xc9   : > { %v594_v62 = vpop.permute.xlu1 %593  ;;  %v592_v63 = vpop.permute.xlu0 %591 }
  0xca   : > { %v599_v1 = vsel %vm597_vm7, %v594_v62, %v596_v61  ;;  %v598_v2 = vsel %vm597_vm7, %v592_v63, %v594_v62 }
  0xcb   : > { %931 = vmatpush.msk.msrb.mxu0 %vm224_vm0, %v598_v2  ;;  %933 = vmatpush.msk.msrb.mxu1 %vm224_vm0, %v599_v1 }
  0xcc   : > { %932 = vmatmul.msk.f32.vlgmr.msrb.gmra.mxu0 %vm220_vm1, %v930_v0  ;;  %934 = vmatmul.msk.f32.vlgmr.msrb.gmra.mxu1 %vm220_vm1, %v930_v0 }
  0xd1   : > { %v660_v4 = vpop.permute.xlu1 %659  ;;  %v658_v5 = vpop.permute.xlu0 %657 }
  0xd2   : > { %v665_v7 = vsel %vm663_vm8, %v660_v4, %v662_v3  ;;  %v664_v8 = vsel %vm663_vm8, %v658_v5, %v660_v4 }
  0xd3   : > { %936 = vmatpush.msk.msrb.mxu2 %vm224_vm0, %v664_v8  ;;  %938 = vmatpush.msk.msrb.mxu3 %vm224_vm0, %v665_v7 }
  0xd4   : > { %937 = vmatmul.msk.f32.vlgmr.msrb.gmra.mxu2 %vm220_vm1, %v935_v6  ;;  %939 = vmatmul.msk.f32.vlgmr.msrb.gmra.mxu3 %vm220_vm1, %v935_v6 }
  0xd9   : > { %v726_v10 = vpop.permute.xlu1 %725  ;;  %v724_v11 = vpop.permute.xlu0 %723 }
  0xda   : > { %v731_v13 = vsel %vm729_vm9, %v726_v10, %v728_v9  ;;  %v730_v14 = vsel %vm729_vm9, %v724_v11, %v726_v10 }
  0xdb   : > { %941 = vmatpush.msk.msra.mxu0 %vm224_vm0, %v730_v14  ;;  %943 = vmatpush.msk.msra.mxu1 %vm224_vm0, %v731_v13 }
  0xdc   : > { %942 = vmatmul.msk.f32.vlgmr.msra.gmra.mxu0 %vm220_vm1, %v940_v12  ;;  %944 = vmatmul.msk.f32.vlgmr.msra.gmra.mxu1 %vm220_vm1, %v940_v12 }
  0xe1   : > { %v785_v45 = vpop.permute.xlu0 %784 }
 0x121   : > { %v246_v15 = vpop.f32.mrf.mxu0  ;;  %v266_v16 = vpop.f32.mrf.mxu1 }
 0x122   : > { %v297_v21 = vadd.f32 %v296_v17, %v246_v15  ;;  %v317_v22 = vadd.f32 %v316_v18, %v266_v16 }
 0x129   : > { %v360_v19 = vpop.f32.mrf.mxu0  ;;  %v380_v20 = vpop.f32.mrf.mxu1 }
 0x12a   : > { %v383_v25 = vadd.f32 %v360_v19, %v297_v21  ;;  %v384_v26 = vadd.f32 %v380_v20, %v317_v22 }
 0x137   : > { %v426_v23 = vpop.f32.mrf.mxu2  ;;  %v446_v24 = vpop.f32.mrf.mxu3 }
 0x138   : > { %v449_v29 = vadd.f32 %v426_v23, %v383_v25  ;;  %v450_v30 = vadd.f32 %v446_v24, %v384_v26 }
 0x139   : > { %v492_v27 = vpop.f32.mrf.mxu0  ;;  %v512_v28 = vpop.f32.mrf.mxu1 }
 0x13a   : > { %v515_v33 = vadd.f32 %v492_v27, %v449_v29  ;;  %v516_v34 = vadd.f32 %v512_v28, %v450_v30 }
 0x147   : > { %v558_v31 = vpop.f32.mrf.mxu2  ;;  %v578_v32 = vpop.f32.mrf.mxu3 }
 0x148   : > { %v581_v37 = vadd.f32 %v558_v31, %v515_v33  ;;  %v582_v38 = vadd.f32 %v578_v32, %v516_v34 }
 0x149   : > { %v624_v35 = vpop.f32.mrf.mxu0  ;;  %v644_v36 = vpop.f32.mrf.mxu1 }
 0x14a   : > { %v647_v39 = vadd.f32 %v624_v35, %v581_v37  ;;  %v648_v40 = vadd.f32 %v644_v36, %v582_v38 }
 0x157   : > { %v690_v41 = vpop.f32.mrf.mxu2  ;;  %v710_v42 = vpop.f32.mrf.mxu3 }
 0x158   : > { %v713_v43 = vadd.f32 %v690_v41, %v647_v39  ;;  %v714_v44 = vadd.f32 %v710_v42, %v648_v40 }
 0x159   : > { %v756_v46 = vpop.f32.mrf.mxu0  ;;  %v776_v47 = vpop.f32.mrf.mxu1 }
 0x15a   : > { %v779_v48 = vadd.f32 %v756_v46, %v713_v43  ;;  %v780_v49 = vadd.f32 %v776_v47, %v714_v44 }
 0x15c   : > { %v787_v50 = vadd.f32 %v785_v45, %v779_v48  ;;  %v788_v51 = vadd.f32 %v785_v45, %v780_v49 }
 0x15e   : > { %v789_v52 = vmax.f32 %v787_v50, 0.0  ;;  %v790_v53 = vmax.f32 %v788_v51, 0.0 }
 0x160   : > { %791 = vst [vmem:[%s187_s6] sm:$0xff] %v789_v52 }
 0x161   : > { %792 = vst [vmem:[%s187_s6 + $0x8] sm:$0xff] %v790_v53 }
 0x162   : > { %1061 = shalt.err (!%p1058_p7)
}
 0x163   : > { %953 = dma.vmem_to_hbm [thread:$0]  (%p1210_p3), %s810_s7, 256, %s812_s8, %s794_s9  }
 0x164 PF: > { %p959_p9 = scmp.ge.s32.totalorder %s1128_s19, 2  ;;  %s823_s27 = sand.u32 1, %s1100_s12  }
 0x165   : > { %s824_s4 = scalar_lea.sflag [#allocation3], %s823_s27 }
 0x166   : > { %p956_p10 = pnand %p959_p9, %p1219_p8 }
 0x168   : > { %p957_p11 = pneg %p956_p10 }
 0x16a   : > { %1095 = dma.done.wait (%p957_p11), %s824_s4, 256  }
 0x16b   : > { %1097 = vsyncadd (%p957_p11), %s824_s4, 4294967040  ;;  %s16_s19 = sadd.s32 1, %s1128_s19   ;;  %s1372_s12 = smov %s1104_s13 }
 0x16c   : > { %p13_p12 = scmp.ge.s32.totalorder %s16_s19, 6   ;;  %s1373_s13 = smov %s1108_s14 }
 0x16d   : > { %s1374_s14 = smov %s1228_s30  ;;  %s1375_s15 = smov %s1120_s17 }
 0x16e   : > { %s1376_s16 = smov %s1124_s18  ;;  %s1377_s17 = smov %s1380_s22 }
 0x16f   : > { %s1378_s18 = smov %s1384_s23  ;;  %15 = sbr.rel (!%p13_p12) target bundleno = 5 (0x5), region = 83 }
 0x174   :  { %830 = vsyncpa [#allocation3], 1 }
 0x175   :  { %832 = vsyncpa [#allocation3 + $0x1], 1 }

</bundles_post_ra>
